<compile_context>
chip_gen: v6e
topology: v6e:2x2x1
jax: 0.10.0
libtpu: 0.0.40
codegen_flags: <defaults>
</compile_context>

<pallas_src>
import jax
import jax.numpy as jnp
from jax.experimental import pallas as pl
from jax.experimental.pallas import tpu as pltpu


def _mlp_kernel(x_ref, w1_ref, b1_ref, w2_ref, b2_ref, w3_ref, b3_ref, o_ref):
    """Fused 3-layer MLP, feature-major: x_ref is (in_dim, TB), o_ref is (out_dim, TB)."""
    xb = x_ref[...].astype(jnp.bfloat16)

    # Layer 1: (hid, in) @ (in, TB) -> (hid, TB); bf16 MXU, f32 accumulate.
    h1 = jnp.dot(w1_ref[...], xb, preferred_element_type=jnp.float32) + b1_ref[...]
    h1 = jnp.maximum(h1, 0.0)                      # ReLU in f32 (VPU)
    # dropout(p=0.01) is identity at inference time — no-op.

    # Layer 2: (hid//2, hid) @ (hid, TB) -> (hid//2, TB)
    h2 = jnp.dot(w2_ref[...], h1.astype(jnp.bfloat16),
                 preferred_element_type=jnp.float32) + b2_ref[...]
    h2 = jnp.maximum(h2, 0.0)
    # dropout(p=0.01) is identity at inference time — no-op.

    # Layer 3: (out, hid//2) @ (hid//2, TB) -> (out, TB)
    z3 = jnp.dot(w3_ref[...], h2.astype(jnp.bfloat16),
                 preferred_element_type=jnp.float32) + b3_ref[...]
    o_ref[...] = jax.nn.sigmoid(z3).astype(o_ref.dtype)   # sigmoid in f32 (EUP)


def animal_classifier_forward(x, params, *, max_batch_tile=512):
    """x: (B, in_dim) float32.  params: w1,w2,w3 as (out,in) f32; b1,b2,b3 as (out,1) f32."""
    # Cast weights to bf16 once (MXU fast path); keep biases f32 for f32 elementwise math.
    w1 = params["w1"].astype(jnp.bfloat16)
    w2 = params["w2"].astype(jnp.bfloat16)
    w3 = params["w3"].astype(jnp.bfloat16)
    b1 = params["b1"].astype(jnp.float32)
    b2 = params["b2"].astype(jnp.float32)
    b3 = params["b3"].astype(jnp.float32)

    B, in_dim = x.shape
    hid = w1.shape[0]
    hid2 = w2.shape[0]
    out_dim = w3.shape[0]

    # Pad batch to a multiple of 128 (lane width) and pick the largest tile that divides it.
    b_pad = ((B + 127) // 128) * 128
    tb = 128
    for t in (1024, 512, 256, 128):
        if t <= max_batch_tile and b_pad % t == 0:
            tb = t
            break
    grid = (b_pad // tb,)

    # Feature-major input: (in_dim, b_pad); padded columns are zeros (sliced off below).
    xt = jnp.pad(x.T.astype(jnp.float32), ((0, 0), (0, b_pad - B)))

    # Weights / biases: constant index_map -> VMEM-resident across all batch tiles.
    resident = lambda shape: pl.BlockSpec(shape, lambda i: (0, 0))

    flops = 2 * b_pad * (in_dim * hid + hid * hid2 + hid2 * out_dim)
    bytes_accessed = (
        in_dim * b_pad * 4                      # x tile traffic (f32)
        + out_dim * b_pad * 4                   # output traffic (f32)
        + (in_dim * hid + hid * hid2 + hid2 * out_dim) * 2   # bf16 weights
        + (hid + hid2 + out_dim) * 4            # f32 biases
    )

    out_t = pl.pallas_call(
        _mlp_kernel,
        out_shape=jax.ShapeDtypeStruct((out_dim, b_pad), jnp.float32),
        grid_spec=pltpu.PrefetchScalarGridSpec(
            num_scalar_prefetch=0,
            grid=grid,
            in_specs=[
                pl.BlockSpec((in_dim, tb), lambda i: (0, i)),   # x: tiled over batch
                resident(w1.shape), resident(b1.shape),
                resident(w2.shape), resident(b2.shape),
                resident(w3.shape), resident(b3.shape),
            ],
            out_specs=pl.BlockSpec((out_dim, tb), lambda i: (0, i)),
        ),
        compiler_params=pltpu.CompilerParams(
            dimension_semantics=("parallel",),   # batch axis -> both TCs on v7x
        ),
        cost_estimate=pl.CostEstimate(
            flops=flops,
            transcendentals=b_pad * out_dim,     # sigmoid
            bytes_accessed=bytes_accessed,
        ),
    )(xt, w1, b1, w2, b2, w3, b3)

    # Back to PyTorch-style (B, out_dim); drop batch padding.
    return out_t[:, :B].T


def init_params(key, in_dim, hid_dim, out_dim):
    """Deterministic init mimicking nn.Linear's U(-1/sqrt(fan_in), 1/sqrt(fan_in)).

    Weights stored as (out_features, in_features) — same as nn.Linear.weight.
    Biases stored as (out_features, 1) columns (lane-broadcast friendly).
    """
    ks = jax.random.split(key, 6)

    def linear(kw, kb, fan_in, fan_out):
        bound = 1.0 / jnp.sqrt(jnp.float32(fan_in))
        w = jax.random.uniform(kw, (fan_out, fan_in), jnp.float32, -bound, bound)
        b = jax.random.uniform(kb, (fan_out, 1), jnp.float32, -bound, bound)
        return w, b

    w1, b1 = linear(ks[0], ks[1], in_dim, hid_dim)
    w2, b2 = linear(ks[2], ks[3], hid_dim, hid_dim // 2)
    w3, b3 = linear(ks[4], ks[5], hid_dim // 2, out_dim)
    return {"w1": w1, "b1": b1, "w2": w2, "b2": b2, "w3": w3, "b3": b3}


def _reference_forward(x, params):
    """Pure-JAX reference with the same bf16 weight/activation quantization as the kernel."""
    q = lambda a: a.astype(jnp.bfloat16).astype(jnp.float32)
    h = jnp.maximum(q(x) @ q(params["w1"]).T + params["b1"].T, 0.0)
    h = jnp.maximum(q(h) @ q(params["w2"]).T + params["b2"].T, 0.0)
    return jax.nn.sigmoid(q(h) @ q(params["w3"]).T + params["b3"].T)


if __name__ == "__main__":
    in_dim, hid_dim, out_dim = 16, 32, 4
    batch = 8

    key = jax.random.PRNGKey(0)
    k_x, k_p = jax.random.split(key)
    x = jax.random.normal(k_x, (batch, in_dim), dtype=jnp.float32)
    params = init_params(k_p, in_dim, hid_dim, out_dim)

    out = animal_classifier_forward(x, params)
    jax.block_until_ready(out)

    ref = _reference_forward(x, params)
    assert out.shape == (batch, out_dim)
    assert jnp.allclose(out, ref, atol=2e-3, rtol=2e-3), (
        f"max abs err = {float(jnp.max(jnp.abs(out - ref)))}"
    )

    print("KERNEL_OK")
</pallas_src>

<mosaic_0001>
module attributes {stable_mosaic.version = 11 : i64} {
  func.func @_mlp_kernel(%arg0: i32, %arg1: memref<16x128xf32, #tpu.memory_space<vmem>>, %arg2: memref<32x16xbf16, #tpu.memory_space<vmem>>, %arg3: memref<32x1xf32, #tpu.memory_space<vmem>>, %arg4: memref<16x32xbf16, #tpu.memory_space<vmem>>, %arg5: memref<16x1xf32, #tpu.memory_space<vmem>>, %arg6: memref<4x16xbf16, #tpu.memory_space<vmem>>, %arg7: memref<4x1xf32, #tpu.memory_space<vmem>>, %arg8: memref<4x128xf32, #tpu.memory_space<vmem>>) attributes {dimension_semantics = [#tpu.dimension_semantics<parallel>], iteration_bounds = array<i64: 1>, scalar_prefetch = 0 : i64, scratch_operands = 0 : i64, tpu.core_type = #tpu.core_type<tc>, window_params = [{transform_indices = @transform_0, window_bounds = array<i64: 16, 128>}, {pipeline_mode = #tpu.pipeline_mode<synchronous>, transform_indices = @transform_1, window_bounds = array<i64: 32, 16>}, {pipeline_mode = #tpu.pipeline_mode<synchronous>, transform_indices = @transform_2, window_bounds = array<i64: 32, 1>}, {pipeline_mode = #tpu.pipeline_mode<synchronous>, transform_indices = @transform_3, window_bounds = array<i64: 16, 32>}, {pipeline_mode = #tpu.pipeline_mode<synchronous>, transform_indices = @transform_4, window_bounds = array<i64: 16, 1>}, {pipeline_mode = #tpu.pipeline_mode<synchronous>, transform_indices = @transform_5, window_bounds = array<i64: 4, 16>}, {pipeline_mode = #tpu.pipeline_mode<synchronous>, transform_indices = @transform_6, window_bounds = array<i64: 4, 1>}, {transform_indices = @transform_7, window_bounds = array<i64: 4, 128>}]} {
    %c0 = arith.constant 0 : index
    %c0_0 = arith.constant 0 : index
    %0 = vector.load %arg1[%c0, %c0_0] : memref<16x128xf32, #tpu.memory_space<vmem>>, vector<16x128xf32>
    %1 = arith.truncf %0 : vector<16x128xf32> to vector<16x128xbf16>
    %c0_1 = arith.constant 0 : index
    %c0_2 = arith.constant 0 : index
    %2 = vector.load %arg2[%c0_1, %c0_2] : memref<32x16xbf16, #tpu.memory_space<vmem>>, vector<32x16xbf16>
    %cst = arith.constant dense<0.000000e+00> : vector<32x128xf32>
    %3 = tpu.matmul %2, %1, %cst {dimension_numbers = #tpu.dot_dimension_numbers<[1], [0], [0], [1], [0, 0, 1, 1], [], []>} : vector<32x16xbf16>, vector<16x128xbf16>, vector<32x128xf32> -> vector<32x128xf32>
    %c0_3 = arith.constant 0 : index
    %c0_4 = arith.constant 0 : index
    %4 = vector.load %arg3[%c0_3, %c0_4] : memref<32x1xf32, #tpu.memory_space<vmem>>, vector<32x1xf32>
    %5 = vector.broadcast %4 : vector<32x1xf32> to vector<32x128xf32>
    %6 = arith.addf %3, %5 : vector<32x128xf32>
    %cst_5 = arith.constant 0.000000e+00 : f32
    %7 = vector.broadcast %cst_5 : f32 to vector<32x128xf32>
    %8 = arith.maximumf %6, %7 : vector<32x128xf32>
    %c0_6 = arith.constant 0 : index
    %c0_7 = arith.constant 0 : index
    %9 = vector.load %arg4[%c0_6, %c0_7] : memref<16x32xbf16, #tpu.memory_space<vmem>>, vector<16x32xbf16>
    %10 = arith.truncf %8 : vector<32x128xf32> to vector<32x128xbf16>
    %cst_8 = arith.constant dense<0.000000e+00> : vector<16x128xf32>
    %11 = tpu.matmul %9, %10, %cst_8 {dimension_numbers = #tpu.dot_dimension_numbers<[1], [0], [0], [1], [0, 0, 1, 1], [], []>} : vector<16x32xbf16>, vector<32x128xbf16>, vector<16x128xf32> -> vector<16x128xf32>
    %c0_9 = arith.constant 0 : index
    %c0_10 = arith.constant 0 : index
    %12 = vector.load %arg5[%c0_9, %c0_10] : memref<16x1xf32, #tpu.memory_space<vmem>>, vector<16x1xf32>
    %13 = vector.broadcast %12 : vector<16x1xf32> to vector<16x128xf32>
    %14 = arith.addf %11, %13 : vector<16x128xf32>
    %cst_11 = arith.constant 0.000000e+00 : f32
    %15 = vector.broadcast %cst_11 : f32 to vector<16x128xf32>
    %16 = arith.maximumf %14, %15 : vector<16x128xf32>
    %c0_12 = arith.constant 0 : index
    %c0_13 = arith.constant 0 : index
    %17 = vector.load %arg6[%c0_12, %c0_13] : memref<4x16xbf16, #tpu.memory_space<vmem>>, vector<4x16xbf16>
    %18 = arith.truncf %16 : vector<16x128xf32> to vector<16x128xbf16>
    %cst_14 = arith.constant dense<0.000000e+00> : vector<4x128xf32>
    %19 = tpu.matmul %17, %18, %cst_14 {dimension_numbers = #tpu.dot_dimension_numbers<[1], [0], [0], [1], [0, 0, 1, 1], [], []>} : vector<4x16xbf16>, vector<16x128xbf16>, vector<4x128xf32> -> vector<4x128xf32>
    %c0_15 = arith.constant 0 : index
    %c0_16 = arith.constant 0 : index
    %20 = vector.load %arg7[%c0_15, %c0_16] : memref<4x1xf32, #tpu.memory_space<vmem>>, vector<4x1xf32>
    %21 = vector.broadcast %20 : vector<4x1xf32> to vector<4x128xf32>
    %22 = arith.addf %19, %21 : vector<4x128xf32>
    %23 = arith.negf %22 : vector<4x128xf32>
    %24 = math.exp %23 : vector<4x128xf32>
    %cst_17 = arith.constant 1.000000e+00 : f32
    %25 = vector.broadcast %cst_17 : f32 to vector<4x128xf32>
    %26 = arith.addf %25, %24 : vector<4x128xf32>
    %27 = arith.divf %25, %26 : vector<4x128xf32>
    %c0_18 = arith.constant 0 : index
    %c0_19 = arith.constant 0 : index
    %28 = vector.load %arg8[%c0_18, %c0_19] : memref<4x128xf32, #tpu.memory_space<vmem>>, vector<4x128xf32>
    tpu.vector_store %arg8[%c0_18, %c0_19], %27 {strides = array<i32>} : memref<4x128xf32, #tpu.memory_space<vmem>>, vector<4x128xf32>,
    return
  }
  func.func @transform_0(%arg0: i32) -> (i32, i32) {
    %c0_i32 = arith.constant 0 : i32
    %c0_i32_0 = arith.constant 0 : i32
    return %c0_i32, %arg0 : i32, i32
  }
  func.func @transform_1(%arg0: i32) -> (i32, i32) {
    %c0_i32 = arith.constant 0 : i32
    %c0_i32_0 = arith.constant 0 : i32
    %c0_i32_1 = arith.constant 0 : i32
    return %c0_i32, %c0_i32_0 : i32, i32
  }
  func.func @transform_2(%arg0: i32) -> (i32, i32) {
    %c0_i32 = arith.constant 0 : i32
    %c0_i32_0 = arith.constant 0 : i32
    %c0_i32_1 = arith.constant 0 : i32
    return %c0_i32, %c0_i32_0 : i32, i32
  }
  func.func @transform_3(%arg0: i32) -> (i32, i32) {
    %c0_i32 = arith.constant 0 : i32
    %c0_i32_0 = arith.constant 0 : i32
    %c0_i32_1 = arith.constant 0 : i32
    return %c0_i32, %c0_i32_0 : i32, i32
  }
  func.func @transform_4(%arg0: i32) -> (i32, i32) {
    %c0_i32 = arith.constant 0 : i32
    %c0_i32_0 = arith.constant 0 : i32
    %c0_i32_1 = arith.constant 0 : i32
    return %c0_i32, %c0_i32_0 : i32, i32
  }
  func.func @transform_5(%arg0: i32) -> (i32, i32) {
    %c0_i32 = arith.constant 0 : i32
    %c0_i32_0 = arith.constant 0 : i32
    %c0_i32_1 = arith.constant 0 : i32
    return %c0_i32, %c0_i32_0 : i32, i32
  }
  func.func @transform_6(%arg0: i32) -> (i32, i32) {
    %c0_i32 = arith.constant 0 : i32
    %c0_i32_0 = arith.constant 0 : i32
    %c0_i32_1 = arith.constant 0 : i32
    return %c0_i32, %c0_i32_0 : i32, i32
  }
  func.func @transform_7(%arg0: i32) -> (i32, i32) {
    %c0_i32 = arith.constant 0 : i32
    %c0_i32_0 = arith.constant 0 : i32
    return %c0_i32, %arg0 : i32, i32
  }
}

</mosaic_0001>

<bundles_post_ra>
// kernel: tpu_custom_call.1
= control target key start
LH: loop header
LB: loop body
LE: loop exit
PB: predicated region body
PF: predicated region fallthrough
CT: control target
= control target key end

     0   :  { %vm69_vm0 = vcmask 130048   ;;  %v340_v4 = vmov 0   ;;  %s429_s0 = inlined_call_operand.vmem [shape: f32[16,128], index: 0, kind: input, shape index: {}]   ;;  %s430_s1 = inlined_call_operand.vmem [shape: bf16[32,16], index: 1, kind: input, shape index: {}]   ;;  %s431_s2 = inlined_call_operand.vmem [shape: f32[32,1], index: 2, kind: input, shape index: {}]   ;;  %s432_s3 = inlined_call_operand.vmem [shape: bf16[16,32], index: 3, kind: input, shape index: {}]   ;;  %s433_s4 = inlined_call_operand.vmem [shape: f32[16,1], index: 4, kind: input, shape index: {}]   ;;  %s434_s5 = inlined_call_operand.vmem [shape: bf16[4,16], index: 5, kind: input, shape index: {}]   ;;  %s435_s6 = inlined_call_operand.vmem [shape: f32[4,1], index: 6, kind: input, shape index: {}]   ;;  %s436_s7 = inlined_call_operand.hbm [shape: f32[4,128], index: 7, kind: output, shape index: {}]  }
   0x1   :  { %v28_v0 = vld [vmem:[%s429_s0] sm:$0xff]  ;;  %v29_v1 = vld [vmem:[%s429_s0 + $0x8] sm:$0xff]  ;;  %309 = vset.pattern.permute.xlu0 %v340_v4  ;;  %310 = vset.pattern.permute.xlu1 %v340_v4  ;;  %v37_v5 = vld [vmem:[%s431_s2 + $0x10] sm:$0xff] }
   0x2   :  { %v30_v2 = vpack.c.bf16 %v29_v1, %v28_v0  ;;  %v311_v3 = vld [vmem:[%s430_s1] sm:$0xff]   ;;  %v312_v6 = vld [vmem:[%s430_s1 + $0x8] sm:$0xff]   ;;  %51 = vperm.xlu0 %309, %v37_v5   ;;  %v38_v8 = vld [vmem:[%s431_s2 + $0x18] sm:$0xff] }
   0x3   :  { %287 = vmatprep.mubr.msk.bf16.mxu0 %vm69_vm0, %v311_v3  ;;  %v35_v7 = vld [vmem:[%s431_s2] sm:$0xff] }
   0x4   :  { %285 = vmatprep.subr.bf16.mxu0 %v30_v2  ;;  %41 = vperm.xlu1 %310, %v35_v7  }
   0x5   :  { %286 = vmatpush3.bf16.msra.mxu0 %v30_v2 }
   0x6   :  { %12 = vsyncpa [#allocation3], 0  ;;  %v36_v9 = vld [vmem:[%s431_s2 + $0x8] sm:$0xff]  ;;  %56 = vperm.xlu0 %309, %v38_v8   ;;  %v133_v10 = vld [vmem:[%s433_s4] sm:$0xff]  ;;  %v341_v13 = vmov 0.0   ;;  %vm342_vm1 = vmmov 0  }
   0x7   :  { %v134_v11 = vld [vmem:[%s433_s4 + $0x8] sm:$0xff]  ;;  %v199_v12 = vld [vmem:[%s435_s6] sm:$0xf]  ;;  %291 = vmatprep.subr.bf16.mxu1 %v341_v13  ;;  %299 = vmatprep.subr.bf16.mxu0 %v341_v13  ;;  %vm150_vm2 = vcmask 261120  }
   0x8   :  { %288 = vmatmul.mubr.msk.bf16.vlgmr.msra.gmra.mxu0 %vm69_vm0, %v312_v6  ;;  %46 = vperm.xlu1 %310, %v36_v9   ;;  %v313_v32 = vld [vmem:[%s432_s3] sm:$0xff]   ;;  %s343_s3 = smov [#allocation2]  }
   0x9   :  { %295 = vmatprep.mubr.msk.bf16.mxu1 %vm342_vm1, %v341_v13  ;;  %301 = vmatprep.mubr.msk.bf16.mxu0 %vm342_vm1, %v341_v13  ;;  %v197_v44 = vld [vmem:[%s434_s5] sm:$0x3]  ;;  %s261_s22 = sshll.u32 %s343_s3, 4  ;;  %s262_s22 = int_to_ptr.vmem [resolvable:$true] %s261_s22 }
   0xa   :  { %137 = vperm.xlu0 %309, %v133_v10   ;;  %s318_s23 = scalar_lea.vmem %s262_s22, 64  ;;  %p323_p1 = scmp.lt.s32.totalorder %s262_s22, %s262_s22 }
   0xb   :  { %p319_p0 = scmp.ne.s32.totalorder %s262_s22, %s318_s23  ;;  %p324_p2 = scmp.lt.s32.totalorder %s318_s23, %s318_s23 }
   0xc   :  { %142 = vperm.xlu1 %310, %v134_v11  }
   0xd   :  { %p325_p3 = por %p324_p2, %p323_p1 }
   0xe   :  { %202 = vperm.xlu0 %309, %v199_v12  }
   0xf   :  { %p326_p4 = pnand %p325_p3, %p319_p0 }
  0x7d   :  { %v52_v14 = vpop.permute.xlu0 %51 }
  0x7f   :  { %v42_v15 = vpop.permute.xlu1 %41 }
  0x81   :  { %v57_v19 = vpop.permute.xlu0 %56 }
  0x83   :  { %v47_v22 = vpop.permute.xlu1 %46 }
  0x85   :  { %v138_v34 = vpop.permute.xlu0 %137 }
  0x87   :  { %v143_v37 = vpop.permute.xlu1 %142 }
  0x89   :  { %v203_v45 = vpop.permute.xlu0 %202 }
  0xc8   :  { %v289_v16 = vpop.f32.mrf.mxu0 }
  0xc9   :  { %v119_v18 = vadd.f32 %v289_v16, %v52_v14 }
  0xca   :  { %v110_v17 = vpop.f32.mrf.mxu0 }
  0xcb   :  { %v127_v24 = vmax.f32 %v119_v18, 0.0  ;;  %v111_v25 = vadd.f32 %v110_v17, %v42_v15 }
  0xcc   :  { %v290_v20 = vpop.f32.mrf.mxu0 }
  0xcd   :  { %v122_v21 = vadd.f32 %v290_v20, %v57_v19  ;;  %v125_v30 = vmax.f32 %v111_v25, 0.0 }
  0xce   :  { %v113_v23 = vpop.f32.mrf.mxu0 }
  0xcf   :  { %v128_v26 = vmax.f32 %v122_v21, 0.0  ;;  %v114_v27 = vadd.f32 %v113_v23, %v47_v22 }
  0xd1   :  { %v126_v28 = vmax.f32 %v114_v27, 0.0  ;;  %v132_v29 = vpack.c.bf16 %v128_v26, %v127_v24 }
  0xd3   :  { %292 = vmatpush3.bf16.msra.mxu1 %v132_v29  ;;  %v131_v31 = vpack.c.bf16 %v126_v28, %v125_v30 }
  0xd4   :  { %293 = vmatprep.subr.bf16.mxu1 %v341_v13 }
  0xd7   :  { %294 = vmatpush3.bf16.msra.mxu1 %v131_v31 }
  0xda   :  { %296 = vmatmul.mubr.msk.bf16.vlgmr.msra.gmra.mxu1 %vm150_vm2, %v313_v32 }
 0x19a   :  { %v188_v33 = vpop.f32.mrf.mxu1 }
 0x19b   :  { %v189_v36 = vadd.f32 %v188_v33, %v138_v34 }
 0x19c   :  { %v297_v35 = vpop.f32.mrf.mxu1 }
 0x19d   :  { %v195_v41 = vmax.f32 %v189_v36, 0.0 }
 0x19e   :  { %v191_v38 = vpop.f32.mrf.mxu1 }
 0x19f   :  { %v192_v39 = vadd.f32 %v191_v38, %v143_v37 }
 0x1a0   :  { %v298_v40 = vpop.f32.mrf.mxu1 }
 0x1a1   :  { %v196_v42 = vmax.f32 %v192_v39, 0.0 }
 0x1a3   :  { %v198_v43 = vpack.c.bf16 %v196_v42, %v195_v41 }
 0x1a5   :  { %300 = vmatpush3.bf16.msra.mxu0 %v198_v43 }
 0x1a8   :  { %302 = vmatmul.mubr.msk.bf16.vlgmr.msra.gmra.mxu0 %vm69_vm0, %v197_v44 }
 0x268   :  { %v242_v46 = vpop.f32.mrf.mxu0 }
 0x269   :  { %v243_v47 = vadd.f32 %v242_v46, %v203_v45 }
 0x26a   :  { %v303_v48 = vpop.f32.mrf.mxu0 }
 0x26b   :  { %v276_v49 = vmul.f32 -1.442695, %v243_v47 }
 0x26c   :  { %v245_v50 = vpop.f32.mrf.mxu0 }
 0x26d   :  { %314 = vpow2.f32 %v276_v49 }
 0x26e   :  { %v304_v51 = vpop.f32.mrf.mxu0 }
 0x27a   :  { %v315_v52 = vpop.eup %314 }
 0x27b   :  { %v251_v53 = vadd.f32 1.0, %v315_v52 }
 0x27d   :  { %316 = vrcp.f32 %v251_v53 }
 0x28a   :  { %v317_v54 = vpop.eup %316 }
 0x28b   :  { %254 = vst [vmem:[#allocation2] sm:$0xf] %v317_v54 }
 0x28c   :  { %329 = shalt.err (!%p326_p4)
}
 0x28d   :  { %264 = dma.vmem_to_hbm [thread:$0]  %s262_s22, 64, %s436_s7, [#allocation3]  }
 0x28e   :  { %338 = dma.done.wait [#allocation3], 64  }
 0x28f   :  { %339 = vsyncadd [#allocation3], 4294967232 }
 0x290   :  { %268 = vsyncpa [#allocation3], 1 }

</bundles_post_ra>
